<compile_context>
chip_gen: v5e
topology: v5e:2x2
jax: 0.10.0
libtpu: 0.0.40
codegen_flags: <defaults>
</compile_context>

<pallas_src>
import math

import jax
import jax.numpy as jnp
from jax.experimental import pallas as pl
from jax.experimental.pallas import tpu as pltpu


def _make_kernel(n_row_copies, copy_cols):
    """One one-hot matmul for column upsampling, then lane-dense stores."""

    def kernel(x_ref, r_ref, o_ref):
        # Exact selection: each output element accumulates exactly one nonzero
        # term, so accumulate in the output dtype directly (no f32 temp/cast).
        y = jnp.dot(x_ref[...], r_ref[...], preferred_element_type=o_ref.dtype)
        if n_row_copies == 1:
            o_ref[...] = y
        else:
            for k in range(n_row_copies):  # static unroll: dense stores
                o_ref[:, k * copy_cols:(k + 1) * copy_cols] = y

    return kernel


def _sublane_multiple(dtype):
    # (8,128) tile is for 32-bit; packed dtypes need 16 (bf16) / 32 (int8/fp8)
    # rows to fill a native tile.
    return {4: 8, 2: 16, 1: 32}.get(jnp.dtype(dtype).itemsize, 8)


def _pick_rows_per_block(rows, in_row_bytes, out_row_bytes, sublane,
                         target_out_bytes=8 << 20, vmem_budget_bytes=24 << 20):
    """Row block: sublane-multiple, VMEM-budgeted, >=2 grid steps when possible."""
    if rows <= sublane:
        return rows
    per_row = 2 * (in_row_bytes + out_row_bytes)          # double-buffered in+out
    cap = min(rows,
              max(sublane, vmem_budget_bytes // max(per_row, 1)),
              max(sublane, target_out_bytes // max(out_row_bytes, 1)))
    # Keep at least 2 grid steps so v7x's two TensorCores can split the grid.
    cap = min(cap, max(sublane, rows // 2))
    cap = (cap // sublane) * sublane
    # Prefer an exact divisor (no masked last block); otherwise a cdiv grid
    # with a partial, write-masked last block is used by the caller.
    for cand in range(cap, sublane - 1, -sublane):
        if rows % cand == 0:
            return cand
    return max(cap, sublane)


def upsample_nearest(x, scale_factor=2):
    """Pallas equivalent of Upsample(scale_factor=..., mode='nearest')(x)."""
    if isinstance(scale_factor, (tuple, list)):
        sh, sw = int(scale_factor[0]), int(scale_factor[1])
    else:
        sh = sw = int(scale_factor)
    assert sh >= 1 and sw >= 1, "integer scale_factor >= 1 required"

    N, C, H, W = x.shape
    Ho, Wo = H * sh, W * sw
    M = N * C * H
    dtype = x.dtype
    itemsize = jnp.dtype(dtype).itemsize
    sublane = _sublane_multiple(dtype)

    # One-hot nearest column map: r_col[w, j] = 1 iff w == j // sw.
    col_src = jnp.arange(Wo, dtype=jnp.int32) // sw
    r_col = (jnp.arange(W, dtype=jnp.int32)[:, None] == col_src[None, :]).astype(dtype)

    if Wo % 128 == 0:
        # Path A: output rows already lane-dense.  Column-only R (sh x smaller);
        # the sh row copies become unrolled dense stores in the kernel.
        G = 1
        n_row_copies = sh
        R = r_col                                            # (W, Wo)
    else:
        # Path B: fold G input rows per kernel row (block-diagonal R) so the
        # stored last dim is a multiple of 128 -> unmasked dense stores.
        g0 = 128 // math.gcd(sh * Wo, 128)
        r_bytes_folded = (g0 * W) * (g0 * sh * Wo) * itemsize
        G = g0 if (M % g0 == 0 and r_bytes_folded <= (2 << 20)) else 1
        r_row = jnp.tile(r_col, (1, sh))                     # (W, sh*Wo)
        R = r_row if G == 1 else jnp.kron(jnp.eye(G, dtype=dtype), r_row)
        n_row_copies = 1

    rows = M // G
    in_cols = G * W
    out_cols = G * sh * Wo
    x_rows = x.reshape(rows, in_cols)                        # free reshape

    in_row_bytes = in_cols * itemsize
    out_row_bytes = out_cols * itemsize
    r_bytes = int(R.size) * itemsize
    budget = max((24 << 20) - 2 * r_bytes, 4 << 20)
    m_blk = _pick_rows_per_block(rows, in_row_bytes, out_row_bytes, sublane,
                                 vmem_budget_bytes=budget)
    grid = (pl.cdiv(rows, m_blk),)

    out_flat = pl.pallas_call(
        _make_kernel(n_row_copies, Wo),
        out_shape=jax.ShapeDtypeStruct((rows, out_cols), dtype),
        grid=grid,
        in_specs=[
            pl.BlockSpec((m_blk, in_cols), lambda i: (i, 0)),
            # Constant index_map: R stays resident across grid steps.
            pl.BlockSpec(R.shape, lambda i: (0, 0)),
        ],
        out_specs=pl.BlockSpec((m_blk, out_cols), lambda i: (i, 0)),
        compiler_params=pltpu.CompilerParams(
            dimension_semantics=("parallel",),
            vmem_limit_bytes=32 * 1024 * 1024,
        ),
    )(x_rows, R)

    # (rows, G*sh*Wo) -> (N, C, H*sh, Wo): pure row-major metadata reshape.
    return out_flat.reshape(N, C, Ho, Wo)


if __name__ == "__main__":
    key = jax.random.PRNGKey(0)
    # Module: Upsample(scale_factor=2, mode='nearest') — no learned params.
    N, C, H, W = 2, 4, 16, 16
    scale = 2

    x = jax.random.normal(key, (N, C, H, W), dtype=jnp.float32)

    out = upsample_nearest(x, scale_factor=scale)
    out = jax.block_until_ready(out)

    # Reference (pure JAX): nearest upsample with integer scale == repeat.
    ref = jnp.repeat(jnp.repeat(x, scale, axis=2), scale, axis=3)

    assert out.shape == (N, C, H * scale, W * scale), out.shape
    assert out.dtype == x.dtype, out.dtype
    assert jnp.allclose(out, ref, rtol=1e-6, atol=1e-6), float(
        jnp.max(jnp.abs(out - ref)))

    print("KERNEL_OK")
</pallas_src>

<mosaic_0001>
module attributes {stable_mosaic.version = 11 : i64} {
  func.func @kernel(%arg0: i32, %arg1: memref<32x32xf32, #tpu.memory_space<vmem>>, %arg2: memref<32x128xf32, #tpu.memory_space<vmem>>, %arg3: memref<32x128xf32, #tpu.memory_space<vmem>>) attributes {dimension_semantics = [#tpu.dimension_semantics<parallel>], iteration_bounds = array<i64: 2>, scalar_prefetch = 0 : i64, scratch_operands = 0 : i64, tpu.core_type = #tpu.core_type<tc>, window_params = [{transform_indices = @transform_0, window_bounds = array<i64: 32, 32>}, {pipeline_mode = #tpu.pipeline_mode<synchronous>, transform_indices = @transform_1, window_bounds = array<i64: 32, 128>}, {transform_indices = @transform_2, window_bounds = array<i64: 32, 128>}]} {
    %c0 = arith.constant 0 : index
    %c0_0 = arith.constant 0 : index
    %0 = vector.load %arg1[%c0, %c0_0] : memref<32x32xf32, #tpu.memory_space<vmem>>, vector<32x32xf32>
    %c0_1 = arith.constant 0 : index
    %c0_2 = arith.constant 0 : index
    %1 = vector.load %arg2[%c0_1, %c0_2] : memref<32x128xf32, #tpu.memory_space<vmem>>, vector<32x128xf32>
    %cst = arith.constant dense<0.000000e+00> : vector<32x128xf32>
    %2 = tpu.matmul %0, %1, %cst {dimension_numbers = #tpu.dot_dimension_numbers<[1], [0], [0], [1], [0, 0, 1, 1], [], []>} : vector<32x32xf32>, vector<32x128xf32>, vector<32x128xf32> -> vector<32x128xf32>
    %c0_3 = arith.constant 0 : index
    %c0_4 = arith.constant 0 : index
    %3 = vector.load %arg3[%c0_3, %c0_4] : memref<32x128xf32, #tpu.memory_space<vmem>>, vector<32x128xf32>
    tpu.vector_store %arg3[%c0_3, %c0_4], %2 {strides = array<i32>} : memref<32x128xf32, #tpu.memory_space<vmem>>, vector<32x128xf32>,
    return
  }
  func.func @transform_0(%arg0: i32) -> (i32, i32) {
    %c0_i32 = arith.constant 0 : i32
    %c0_i32_0 = arith.constant 0 : i32
    return %arg0, %c0_i32 : i32, i32
  }
  func.func @transform_1(%arg0: i32) -> (i32, i32) {
    %c0_i32 = arith.constant 0 : i32
    %c0_i32_0 = arith.constant 0 : i32
    %c0_i32_1 = arith.constant 0 : i32
    return %c0_i32, %c0_i32_0 : i32, i32
  }
  func.func @transform_2(%arg0: i32) -> (i32, i32) {
    %c0_i32 = arith.constant 0 : i32
    %c0_i32_0 = arith.constant 0 : i32
    return %arg0, %c0_i32 : i32, i32
  }
}

</mosaic_0001>

<bundles_post_ra>
// kernel: tpu_custom_call.1
= control target key start
LH: loop header
LB: loop body
LE: loop exit
PB: predicated region body
PF: predicated region fallthrough
CT: control target
= control target key end

     0   :  { %7 = vsyncpa [#allocation3], 0  ;;  %s524_s0 = inlined_call_operand.vmem [shape: f32[64,32], index: 0, kind: input, shape index: {}]   ;;  %s525_s1 = inlined_call_operand.vmem [shape: f32[32,128], index: 1, kind: input, shape index: {}]   ;;  %s526_s2 = inlined_call_operand.hbm [shape: f32[64,128], index: 2, kind: output, shape index: {}]  }
   0x1   :  { %9 = vsyncpa [#allocation3 + $0x1], 0  ;;  %s428_s9 = smov 0   ;;  %s430_s10 = smov 0  }
   0x2   :  { %s432_s11 = smov 0   ;;  %s434_s12 = smov 0  }
   0x3 LB: > { %s449_s13 = sadd.s32 4294967295, %s409_s12   ;;  %s277_s14 = sadd.s32 4294967294, %s409_s12   ;;  %s409_s12 = sphi %s434_s12, %s532_s12   ;;  %s405_s11 = sphi %s432_s11, %s531_s11   ;;  %s401_s10 = sphi %s430_s10, %s530_s10   ;;  %s397_s9 = sphi %s428_s9, %s529_s9  }
   0x4   : > { %s453_s15 = sadd.s32 1, %s409_s12   ;;  %s69_s16 = sadd.s32 1, %s405_s11 }
   0x5   : > { %s66_s17 = ssub.s32 %s409_s12, %s453_s15  ;;  %p79_p0 = scmp.ne.s32.totalorder %s405_s11, %s401_s10 }
   0x6   : > { %p67_p1 = scmp.eq.s32.totalorder %s66_s17, 0  ;;  %p80_p2 = scmp.eq.s32.totalorder %s449_s13, 1 }
   0x7   : > { %p85_p3 = scmp.ne.s32.totalorder %s401_s10, %s397_s9  ;;  %p86_p4 = scmp.eq.s32.totalorder %s277_s14, 1 }
   0x8   : > { %s464_s18 = scalar_select %p67_p1, %s405_s11, %s69_s16  }
   0x9   : > { %p466_p5 = por %p80_p2, %p79_p0  ;;  %p470_p6 = por %p86_p4, %p85_p3 }
   0xa   : > { %p280_p7 = scmp.ge.s32.totalorder %s409_s12, 1  ;;  %p116_p8 = scmp.lt.s32.totalorder %s409_s12, 3 }
   0xc   : > { %p117_p9 = pnand %p280_p7, %p116_p8 }
   0xd   : > { %s282_s25 = sshll.u32 (!%p117_p9), %s449_s13, 2  ;;  %s135_s6 = sand.u32 (!%p117_p9), 1, %s401_s10  }
   0xe   : > { %120 = sbr.rel (%p117_p9) target bundleno = 164 (0xa4), region = 28  ;;  %p139_p10 = scmp.lt.s32.totalorder (!%p117_p9), %s282_s25, 7 }
   0xf   : > { %s281_s7 = sshll.u32 (!%p117_p9), %s135_s6, 5  ;;  %s293_s8 = sshll.u32 (!%p117_p9), %s449_s13, 5 }
  0x10   : > { %s211_s17 = scalar_lea.hbm (!%p117_p9), %s526_s2, %s293_s8  ;;  %s137_s21 = scalar_lea.vmem (!%p117_p9), [#allocation2], %s281_s7 }
  0x11   : > { %s212_s22 = sshll.u32 (!%p117_p9), %s137_s21, 4  ;;  %s214_s23 = sshll.u32 (!%p117_p9), %s211_s17, 4  ;;  %s213_s22 = int_to_ptr.vmem [resolvable:$true] %s212_s22  ;;  %s215_s23 = int_to_ptr.hbm [resolvable:$true] %s214_s23 }
  0x12   : > { %s200_s24 = scalar_lea.sflag (!%p117_p9), [#allocation3], %s135_s6  ;;  %s361_s13 = sshra.s32 (!%p117_p9), %s215_s23, 4  ;;  %s362_s13 = int_to_ptr.hbm [resolvable:$true] %s361_s13 }
  0x13   : > { %v152_v0 = vld [vmem:[%s525_s1 + $0x18] sm:$0xff]  ;;  %v151_v1 = vld [vmem:[%s525_s1 + $0x10] sm:$0xff]  ;;  %v150_v2 = vld [vmem:[%s525_s1 + $0x8] sm:$0xff]  ;;  %s534_s25 = smov (!%p139_p10, %s282_s25), 7  ;;  %vm153_vm0 = vcmask 261120   ;;  %s367_s28 = scalar_lea.hbm %s526_s2, 64 }
  0x14   : > { %295 = vmatpush.msra.mxu2 %v152_v0  ;;  %296 = vmatpush.msra.mxu3 %v152_v0  ;;  %v149_v3 = vld [vmem:[%s525_s1] sm:$0xff]  ;;  %s283_s30 = sshll.u32 %s534_s25, 3  ;;  %s363_s25 = scalar_lea.hbm %s362_s13, 32 }
  0x15   : > { %178 = vmatpush.msra.mxu0 %v152_v0  ;;  %294 = vmatpush.msra.mxu1 %v152_v0  ;;  %s142_s5 = scalar_lea.vmem %s524_s0, %s283_s30  ;;  %p364_p11 = scmp.ne.s32.totalorder %s362_s13, %s363_s25 }
  0x16   : > { %298 = vmatpush.msra.mxu2 %v151_v1  ;;  %299 = vmatpush.msra.mxu3 %v151_v1  ;;  %v147_v4 = vld [vmem:[%s142_s5 + $0x10] sm:$0xff]  ;;  %v148_v5 = vld [vmem:[%s142_s5 + $0x18] sm:$0xff]  ;;  %v145_v6 = vld [vmem:[%s142_s5] sm:$0xff]  ;;  %p368_p0 = scmp.lt.s32.totalorder %s362_s13, %s526_s2  ;;  %p369_p1 = scmp.lt.s32.totalorder %s367_s28, %s363_s25 }
  0x17   : > { %179 = vmatpush.msra.mxu0 %v151_v1  ;;  %297 = vmatpush.msra.mxu1 %v151_v1  ;;  %v146_v7 = vld [vmem:[%s142_s5 + $0x8] sm:$0xff]  ;;  %p365_p12 = pnand %p364_p11, %p466_p5 }
  0x18   : > { %301 = vmatpush.msra.mxu2 %v150_v2  ;;  %302 = vmatpush.msra.mxu3 %v150_v2  ;;  %p370_p2 = por %p369_p1, %p368_p0 }
  0x19   : > { %180 = vmatpush.msra.mxu0 %v150_v2  ;;  %300 = vmatpush.msra.mxu1 %v150_v2  ;;  %p366_p13 = pneg %p365_p12 }
  0x1a   : > { %304 = vmatpush.msra.mxu2 %v149_v3  ;;  %305 = vmatpush.msra.mxu3 %v149_v3 }
  0x1b   : > { %286 = vmatmul.msk.f32.vlgmr.msra.gmra.mxu2 %vm153_vm0, %v147_v4  ;;  %287 = vmatmul.msk.f32.vlgmr.msra.gmra.mxu3 %vm153_vm0, %v148_v5  ;;  %p371_p3 = pnand %p370_p2, %p366_p13 }
  0x1c   : > { %181 = vmatpush.msra.mxu0 %v149_v3  ;;  %303 = vmatpush.msra.mxu1 %v149_v3 }
  0x1d   : > { %284 = vmatmul.msk.f32.vlgmr.msra.gmra.mxu0 %vm153_vm0, %v145_v6  ;;  %285 = vmatmul.msk.f32.vlgmr.msra.gmra.mxu1 %vm153_vm0, %v146_v7 }
  0x9a   : > { %v183_v8 = vpop.f32.mrf.mxu0  ;;  %v186_v9 = vpop.f32.mrf.mxu1 }
  0x9b   : > { %195 = vst [vmem:[%s137_s21] sm:$0xff] %v183_v8 }
  0x9c   : > { %196 = vst [vmem:[%s137_s21 + $0x8] sm:$0xff] %v186_v9 }
  0x9e   : > { %v189_v10 = vpop.f32.mrf.mxu2  ;;  %v192_v11 = vpop.f32.mrf.mxu3 }
  0x9f   : > { %197 = vst [vmem:[%s137_s21 + $0x10] sm:$0xff] %v189_v10 }
  0xa0   : > { %198 = vst [vmem:[%s137_s21 + $0x18] sm:$0xff] %v192_v11 }
  0xa1   : > { %374 = shalt.err (!%p371_p3)
}
  0xa2   : > { %s411_s3 = smov 128   ;;  %s412_s4 = smov 8  }
  0xa3   : > { %306 = dma.vmem_to_hbm [thread:$0]  (%p466_p5), %s213_s22, 512, %s215_s23, %s200_s24, %s411_s3, %s411_s3, %s412_s4  }
  0xa4 PF: > { %p312_p4 = scmp.ge.s32.totalorder %s409_s12, 2  ;;  %s229_s5 = sand.u32 1, %s397_s9  }
  0xa5   : > { %s230_s6 = scalar_lea.sflag [#allocation3], %s229_s5 }
  0xa6   : > { %p309_p7 = pnand %p312_p4, %p470_p6 }
  0xa8   : > { %p310_p8 = pneg %p309_p7 }
  0xaa   : > { %392 = dma.done.wait (%p310_p8), %s230_s6, 512  }
  0xab   : > { %394 = vsyncadd (%p310_p8), %s230_s6, 4294966784  ;;  %p12_p9 = scmp.ge.s32.totalorder %s453_s15, 4   ;;  %s529_s9 = smov %s401_s10 }
  0xac   : > { %s530_s10 = smov %s405_s11  ;;  %s531_s11 = smov %s464_s18 }
  0xad   : > { %s532_s12 = smov %s453_s15  ;;  %14 = sbr.rel (!%p12_p9) target bundleno = 3 (0x3), region = 63 }
  0xb2   :  { %236 = vsyncpa [#allocation3], 1 }
  0xb3   :  { %238 = vsyncpa [#allocation3 + $0x1], 1 }

</bundles_post_ra>
